<compile_context>
chip_gen: v6e
topology: v6e:2x2x1
jax: 0.10.0
libtpu: 0.0.40
codegen_flags: <defaults>
</compile_context>

<pallas_src>
import functools
import math

import jax
import jax.numpy as jnp
from jax.experimental import pallas as pl
from jax.experimental.pallas import tpu as pltpu


def _axis_mlp_kernel(x_ref, w1_ref, b1_ref, w2_ref, b2_ref, o_ref):
    """One lane-dense position tile:  y = W2 @ relu(W1 @ x + b1) + b2.

    Channel-major layout (features on sublanes, positions on lanes):
      x_ref : [Cin,  TM]  input dtype (cast to bf16 in-kernel for the MXU)
      w1_ref: [Hid,  Cin] bf16      b1_ref: [Hid, 1]  f32
      w2_ref: [Cout, Hid] bf16      b2_ref: [Cout, 1] f32
      o_ref : [Cout, TM]  bf16 (lane-dense unmasked stores, half the f32 bytes)
    """
    x = x_ref[...].astype(jnp.bfloat16)
    # First Linear: bf16 MXU inputs, f32 accumulation.
    h = jnp.dot(w1_ref[...], x, preferred_element_type=jnp.float32)
    # Bias + ReLU epilogue in f32 (v5e-safe); biases broadcast along lanes.
    h = jnp.maximum(h + b1_ref[...], 0.0)
    # Second Linear on the tiny [Hid, TM] intermediate.
    y = jnp.dot(w2_ref[...], h.astype(w2_ref.dtype),
                preferred_element_type=jnp.float32)
    o_ref[...] = (y + b2_ref[...]).astype(o_ref.dtype)


def _pick_tile(t, l, cin, cout, x_bytes, out_bytes, tile_cap):
    """Largest lane tile that (a) fits a v7x-safe VMEM budget with double
    buffering, (b) is a multiple of 128 or spans the full position axis, and
    (c) keeps >= 2 grid steps so v7x's two TensorCores both get work."""
    budget = 24 * 1024 * 1024                          # streaming-tile budget
    per_col = 2 * (cin * x_bytes + cout * out_bytes)   # 2 = double buffering
    tm_budget = max(128, (budget // per_col) // 128 * 128)
    cap = max(128, min(int(tile_cap), int(tm_budget)))
    if t <= cap:
        if l == 1 and t >= 256:        # guarantee >= 2 grid steps (dual TC)
            return max(128, (t // 2) // 128 * 128)
        return t                       # single tile spans the position axis
    return (cap // 128) * 128


@functools.partial(jax.jit, static_argnames=("axis", "tile_m", "out_dtype"))
def axis_forward(x, w1, b1, w2, b2, *, axis=1, tile_m=2048,
                 out_dtype=jnp.bfloat16):
    """Axis(Sequential(Linear, ReLU, Linear), axis).forward(x) as one fused
    Pallas kernel.  out_dtype=jnp.float32 gives torch-exact output width at
    ~1.5x the writeback bytes; bf16 is the bandwidth-optimal default."""
    axis = axis % x.ndim
    cin = x.shape[axis]
    hid, cin_w = w1.shape
    cout = w2.shape[0]
    assert cin_w == cin, (cin_w, cin)

    lead = x.shape[:axis]
    trail = x.shape[axis + 1:]
    l = int(math.prod(lead))
    t = int(math.prod(trail))

    # movedim(x, axis, -1) folded into the layout: [lead.., Cin, trail..] ->
    # [L, Cin, T] is a free contiguous-dim merge; features already sit on
    # sublanes and positions on lanes, so no transpose HBM pass is needed.
    # TODO(synk): if `axis` is the last axis (T == 1) a row-major layout would
    # be preferable; this channel-major path stays correct but is slow there.
    x3 = x.reshape(l, cin, t)

    # Tiny (KB-scale) weight/bias preps: bf16 MXU inputs, f32 biases.
    w1b = w1.astype(jnp.bfloat16)
    w2b = w2.astype(jnp.bfloat16)
    b1c = b1.reshape(hid, 1).astype(jnp.float32)
    b2c = b2.reshape(cout, 1).astype(jnp.float32)

    tm = _pick_tile(t, l, cin, cout,
                    x.dtype.itemsize, jnp.dtype(out_dtype).itemsize, tile_m)
    grid = (l, pl.cdiv(t, tm))

    out3 = pl.pallas_call(
        _axis_mlp_kernel,
        out_shape=jax.ShapeDtypeStruct((l, cout, t), out_dtype),
        grid_spec=pltpu.PrefetchScalarGridSpec(
            num_scalar_prefetch=0,
            grid=grid,
            in_specs=[
                # [Cin, TM] slice straight out of the natural layout
                # (strided DMA does the "movedim"); leading dim squeezed.
                pl.BlockSpec((None, cin, tm), lambda i, j: (i, 0, j)),
                pl.BlockSpec((hid, cin), lambda i, j: (0, 0)),   # resident
                pl.BlockSpec((hid, 1), lambda i, j: (0, 0)),     # weights /
                pl.BlockSpec((cout, hid), lambda i, j: (0, 0)),  # biases
                pl.BlockSpec((cout, 1), lambda i, j: (0, 0)),
            ],
            # Lane-dense output tile written directly in [L, Cout, T] layout.
            out_specs=pl.BlockSpec((None, cout, tm), lambda i, j: (i, 0, j)),
        ),
        compiler_params=pltpu.CompilerParams(
            # Independent (batch, position-tile) work -> megacore / v7x dual TC.
            dimension_semantics=("parallel", "parallel"),
            # v7x-aware: <= ~48 MiB of its 64 MiB VMEM; fine on v5e/v6e too.
            vmem_limit_bytes=48 * 1024 * 1024,
        ),
    )(x3, w1b, b1c, w2b, b2c)

    # movedim(net, -1, axis) is also just a free dim split in this layout.
    return out3.reshape(lead + (cout,) + trail)


def _reference(x, w1, b1, w2, b2, *, axis=1, out_dtype=jnp.bfloat16):
    """Plain-JAX Axis(Sequential(Linear, ReLU, Linear), axis) forward mirroring
    the kernel's precision policy (bf16 matmul inputs, f32 accumulation and
    epilogue, out_dtype output)."""
    xm = jnp.moveaxis(x, axis, -1).astype(jnp.bfloat16)       # movedim(x, axis, -1)
    h = jnp.dot(xm, w1.astype(jnp.bfloat16).T,
                preferred_element_type=jnp.float32) + b1
    h = jnp.maximum(h, 0.0).astype(jnp.bfloat16)
    y = jnp.dot(h, w2.astype(jnp.bfloat16).T,
                preferred_element_type=jnp.float32) + b2
    return jnp.moveaxis(y.astype(out_dtype), -1, axis)        # movedim(net, -1, axis)


if __name__ == "__main__":
    # Axis(net=[Linear(4, 32), ReLU(), Linear(32, 8)], axis=1) on an NCHW tensor.
    N, Cin, H, W = 2, 4, 16, 16
    Hid, Cout = 32, 8

    key = jax.random.PRNGKey(0)
    kx, k1, kb1, k2, kb2 = jax.random.split(key, 5)

    x = jax.random.normal(kx, (N, Cin, H, W), dtype=jnp.float32)

    # PyTorch nn.Linear default init: U(-1/sqrt(fan_in), 1/sqrt(fan_in)).
    bnd1 = 1.0 / math.sqrt(Cin)
    w1 = jax.random.uniform(k1, (Hid, Cin), jnp.float32, -bnd1, bnd1)
    b1 = jax.random.uniform(kb1, (Hid,), jnp.float32, -bnd1, bnd1)
    bnd2 = 1.0 / math.sqrt(Hid)
    w2 = jax.random.uniform(k2, (Cout, Hid), jnp.float32, -bnd2, bnd2)
    b2 = jax.random.uniform(kb2, (Cout,), jnp.float32, -bnd2, bnd2)

    out = axis_forward(x, w1, b1, w2, b2, axis=1)
    out = jax.block_until_ready(out)

    ref = _reference(x, w1, b1, w2, b2, axis=1)
    assert out.shape == (N, Cout, H, W), out.shape

    out_f = out.astype(jnp.float32)
    ref_f = ref.astype(jnp.float32)
    max_err = float(jnp.max(jnp.abs(out_f - ref_f)))
    assert jnp.allclose(out_f, ref_f, atol=2e-2, rtol=2e-2), max_err

    print("KERNEL_OK")
</pallas_src>

<mosaic_0001>
module attributes {stable_mosaic.version = 11 : i64} {
  func.func @_axis_mlp_kernel(%arg0: i32, %arg1: i32, %arg2: memref<1x4x256xf32, #tpu.memory_space<vmem>>, %arg3: memref<32x4xbf16, #tpu.memory_space<vmem>>, %arg4: memref<32x1xf32, #tpu.memory_space<vmem>>, %arg5: memref<8x32xbf16, #tpu.memory_space<vmem>>, %arg6: memref<8x1xf32, #tpu.memory_space<vmem>>, %arg7: memref<1x8x256xbf16, #tpu.memory_space<vmem>>) attributes {dimension_semantics = [#tpu.dimension_semantics<parallel>, #tpu.dimension_semantics<parallel>], iteration_bounds = array<i64: 2, 1>, scalar_prefetch = 0 : i64, scratch_operands = 0 : i64, tpu.core_type = #tpu.core_type<tc>, window_params = [{transform_indices = @transform_0, window_bounds = array<i64: 1, 4, 256>}, {pipeline_mode = #tpu.pipeline_mode<synchronous>, transform_indices = @transform_1, window_bounds = array<i64: 32, 4>}, {pipeline_mode = #tpu.pipeline_mode<synchronous>, transform_indices = @transform_2, window_bounds = array<i64: 32, 1>}, {pipeline_mode = #tpu.pipeline_mode<synchronous>, transform_indices = @transform_3, window_bounds = array<i64: 8, 32>}, {pipeline_mode = #tpu.pipeline_mode<synchronous>, transform_indices = @transform_4, window_bounds = array<i64: 8, 1>}, {transform_indices = @transform_5, window_bounds = array<i64: 1, 8, 256>}]} {
    %c0 = arith.constant 0 : index
    %c0_0 = arith.constant 0 : index
    %c0_1 = arith.constant 0 : index
    %0 = vector.load %arg2[%c0, %c0_0, %c0_1] : memref<1x4x256xf32, #tpu.memory_space<vmem>>, vector<1x4x256xf32>
    %1 = vector.shape_cast %0 : vector<1x4x256xf32> to vector<4x256xf32>
    %2 = arith.truncf %1 : vector<4x256xf32> to vector<4x256xbf16>
    %c0_2 = arith.constant 0 : index
    %c0_3 = arith.constant 0 : index
    %3 = vector.load %arg3[%c0_2, %c0_3] : memref<32x4xbf16, #tpu.memory_space<vmem>>, vector<32x4xbf16>
    %cst = arith.constant dense<0.000000e+00> : vector<32x256xf32>
    %4 = tpu.matmul %3, %2, %cst {dimension_numbers = #tpu.dot_dimension_numbers<[1], [0], [0], [1], [0, 0, 1, 1], [], []>} : vector<32x4xbf16>, vector<4x256xbf16>, vector<32x256xf32> -> vector<32x256xf32>
    %c0_4 = arith.constant 0 : index
    %c0_5 = arith.constant 0 : index
    %5 = vector.load %arg4[%c0_4, %c0_5] : memref<32x1xf32, #tpu.memory_space<vmem>>, vector<32x1xf32>
    %6 = vector.broadcast %5 : vector<32x1xf32> to vector<32x256xf32>
    %7 = arith.addf %4, %6 : vector<32x256xf32>
    %cst_6 = arith.constant 0.000000e+00 : f32
    %8 = vector.broadcast %cst_6 : f32 to vector<32x256xf32>
    %9 = arith.maximumf %7, %8 : vector<32x256xf32>
    %c0_7 = arith.constant 0 : index
    %c0_8 = arith.constant 0 : index
    %10 = vector.load %arg5[%c0_7, %c0_8] : memref<8x32xbf16, #tpu.memory_space<vmem>>, vector<8x32xbf16>
    %11 = arith.truncf %9 : vector<32x256xf32> to vector<32x256xbf16>
    %cst_9 = arith.constant dense<0.000000e+00> : vector<8x256xf32>
    %12 = tpu.matmul %10, %11, %cst_9 {dimension_numbers = #tpu.dot_dimension_numbers<[1], [0], [0], [1], [0, 0, 1, 1], [], []>} : vector<8x32xbf16>, vector<32x256xbf16>, vector<8x256xf32> -> vector<8x256xf32>
    %c0_10 = arith.constant 0 : index
    %c0_11 = arith.constant 0 : index
    %13 = vector.load %arg6[%c0_10, %c0_11] : memref<8x1xf32, #tpu.memory_space<vmem>>, vector<8x1xf32>
    %14 = vector.broadcast %13 : vector<8x1xf32> to vector<8x256xf32>
    %15 = arith.addf %12, %14 : vector<8x256xf32>
    %16 = arith.truncf %15 : vector<8x256xf32> to vector<8x256xbf16>
    %c0_12 = arith.constant 0 : index
    %c0_13 = arith.constant 0 : index
    %c0_14 = arith.constant 0 : index
    %17 = vector.load %arg7[%c0_12, %c0_13, %c0_14] : memref<1x8x256xbf16, #tpu.memory_space<vmem>>, vector<1x8x256xbf16>
    %18 = vector.shape_cast %17 : vector<1x8x256xbf16> to vector<8x256xbf16>
    %19 = vector.shape_cast %16 : vector<8x256xbf16> to vector<1x8x256xbf16>
    tpu.vector_store %arg7[%c0_12, %c0_13, %c0_14], %19 {strides = array<i32>} : memref<1x8x256xbf16, #tpu.memory_space<vmem>>, vector<1x8x256xbf16>,
    return
  }
  func.func @transform_0(%arg0: i32, %arg1: i32) -> (i32, i32, i32) {
    %c0_i32 = arith.constant 0 : i32
    %c0_i32_0 = arith.constant 0 : i32
    return %arg0, %c0_i32, %arg1 : i32, i32, i32
  }
  func.func @transform_1(%arg0: i32, %arg1: i32) -> (i32, i32) {
    %c0_i32 = arith.constant 0 : i32
    %c0_i32_0 = arith.constant 0 : i32
    %c0_i32_1 = arith.constant 0 : i32
    return %c0_i32, %c0_i32_0 : i32, i32
  }
  func.func @transform_2(%arg0: i32, %arg1: i32) -> (i32, i32) {
    %c0_i32 = arith.constant 0 : i32
    %c0_i32_0 = arith.constant 0 : i32
    %c0_i32_1 = arith.constant 0 : i32
    return %c0_i32, %c0_i32_0 : i32, i32
  }
  func.func @transform_3(%arg0: i32, %arg1: i32) -> (i32, i32) {
    %c0_i32 = arith.constant 0 : i32
    %c0_i32_0 = arith.constant 0 : i32
    %c0_i32_1 = arith.constant 0 : i32
    return %c0_i32, %c0_i32_0 : i32, i32
  }
  func.func @transform_4(%arg0: i32, %arg1: i32) -> (i32, i32) {
    %c0_i32 = arith.constant 0 : i32
    %c0_i32_0 = arith.constant 0 : i32
    %c0_i32_1 = arith.constant 0 : i32
    return %c0_i32, %c0_i32_0 : i32, i32
  }
  func.func @transform_5(%arg0: i32, %arg1: i32) -> (i32, i32, i32) {
    %c0_i32 = arith.constant 0 : i32
    %c0_i32_0 = arith.constant 0 : i32
    return %arg0, %c0_i32, %arg1 : i32, i32, i32
  }
}

</mosaic_0001>

<bundles_post_ra>
// kernel: axis_forward.1
= control target key start
LH: loop header
LB: loop body
LE: loop exit
PB: predicated region body
PF: predicated region fallthrough
CT: control target
= control target key end

     0   :  { %s642_s18 = smov 0   ;;  %s644_s19 = smov 0   ;;  %s706_s0 = inlined_call_operand.vmem [shape: f32[2,4,256], index: 0, kind: input, shape index: {}]   ;;  %s707_s1 = inlined_call_operand.vmem [shape: bf16[32,4], index: 1, kind: input, shape index: {}]   ;;  %s708_s2 = inlined_call_operand.vmem [shape: f32[32,1], index: 2, kind: input, shape index: {}]   ;;  %s709_s3 = inlined_call_operand.vmem [shape: bf16[8,32], index: 3, kind: input, shape index: {}]   ;;  %s710_s4 = inlined_call_operand.vmem [shape: f32[8,1], index: 4, kind: input, shape index: {}]   ;;  %s711_s5 = inlined_call_operand.vmem [shape: bf16[2,8,256], index: 5, kind: output, shape index: {}]  }
   0x1   :  { %s646_s20 = smov 0  }
   0x2 LB: > { %s27_s21 = sadd.s32 1, %s605_s19  ;;  %p540_p0 = scmp.ge.s32.totalorder %s609_s20, 1  ;;  %s609_s20 = sphi %s646_s20, %s15_s20   ;;  %s605_s19 = sphi %s644_s19, %s713_s19   ;;  %s601_s18 = sphi %s642_s18, %s712_s18  }
   0x3   : > { %p29_p1 = scmp.ge.s32.totalorder %s27_s21, 2  ;;  %p208_p2 = scmp.lt.s32.totalorder %s609_s20, 3 }
   0x5   : > { %s715_s21 = smov (%p29_p1, %s27_s21), 0  ;;  %p209_p3 = pnand %p540_p0, %p208_p2 }
   0x6   : > { %p245_p4 = scmp.lt.s32.totalorder (!%p209_p3), %s601_s18, 1 }
   0x7   : > { %212 = sbr.rel (%p209_p3) target bundleno = 445 (0x1bd), region = 40 }
   0xc   : > { %v611_v0 = vmov 0   ;;  %s717_s18 = smov (!%p245_p4, %s601_s18), 1  ;;  %v275_v1 = vld [vmem:[%s708_s2] sm:$0xff]  ;;  %v277_v2 = vld [vmem:[%s708_s2 + $0x10] sm:$0xff]  ;;  %v276_v3 = vld [vmem:[%s708_s2 + $0x8] sm:$0xff]  ;;  %vm316_vm0 = vcmask 1041408  }
   0xd   : > { %355 = vmatprep.mubr.bf16.mxu0 %v611_v0  ;;  %583 = vset.pattern.permute.xlu1 %v611_v0  ;;  %s554_s26 = sshll.u32 %s717_s18, 3  ;;  %v278_v4 = vld [vmem:[%s708_s2 + $0x18] sm:$0xff]  ;;  %v389_v8 = vld [vmem:[%s710_s4] sm:$0xff]  ;;  %vm309_vm1 = vcmask 31744   ;;  %v586_v12 = vld [vmem:[%s707_s1 + $0x8] sm:$0xff]   ;;  %vm395_vm2 = vcmask 261120  }
   0xe   : > { %582 = vset.pattern.permute.xlu0 %v611_v0  ;;  %431 = vmatprep.mubr.bf16.mxu1 %v611_v0  ;;  %s252_s8 = scalar_lea.vmem %s706_s0, %s554_s26  ;;  %v585_v11 = vld [vmem:[%s707_s1] sm:$0xff]   ;;  %s262_s23 = scalar_lea.vmem %s711_s5, %s554_s26 }
   0xf   : > { %281 = vperm.xlu1 %583, %v275_v1   ;;  %291 = vperm.xlu0 %582, %v277_v2   ;;  %v265_v5 = vld [vmem:[%s252_s8] sm:$0xff] }
  0x10   : > { %v267_v6 = vcombine.high %v265_v5, %v265_v5  ;;  %v269_v7 = vpack.c.bf16 %v265_v5, %v265_v5  ;;  %v384_v45 = vld [vmem:[%s709_s3] sm:$0xf] }
  0x12   : > { %v270_v9 = vpack.c.bf16 %v267_v6, %v267_v6  ;;  %v318_v10 = vsel %vm316_vm0, %v269_v7, 0 }
  0x13   : > { %286 = vperm.xlu1 %583, %v276_v3   ;;  %296 = vperm.xlu0 %582, %v278_v4  }
  0x14   : > { %547 = vmatprep.subr.msk.bf16.mxu0 %vm316_vm0, %v270_v9 }
  0x15   : > { %338 = vmatpush1.bf16.msra.mxu0 %v318_v10 }
  0x17   : > { %392 = vperm.xlu0 %582, %v389_v8  }
  0x18   : > { %548 = vmatmul.mubr.msk.bf16.vlgmr.msra.gmra.mxu0 %vm309_vm1, %v585_v11 }
  0x19   : > { %365 = vmatprep.mubr.bf16.mxu0 %v611_v0 }
  0x20   : > { %549 = vmatmul.mubr.msk.bf16.gmra.mxu0 %vm309_vm1, %v586_v12 }
  0x8a   : > { %v282_v16 = vpop.permute.xlu1 %281  ;;  %v292_v17 = vpop.permute.xlu0 %291 }
  0x8e   : > { %v287_v21 = vpop.permute.xlu1 %286  ;;  %v297_v22 = vpop.permute.xlu0 %296 }
  0x92   : > { %v393_v47 = vpop.permute.xlu0 %392 }
  0xd8   : > { %v357_v13 = vpop.f32.mrf.mxu0 }
  0xd9   : > { %v358_v36 = vadd.f32 %v357_v13, %v282_v16 }
  0xda   : > { %v359_v14 = vpop.f32.mrf.mxu0 }
  0xdb   : > { %v360_v29 = vadd.f32 %v359_v14, %v282_v16  ;;  %v376_v43 = vmax.f32 %v358_v36, 0.0 }
  0xdc   : > { %v361_v15 = vpop.f32.mrf.mxu0 }
  0xdd   : > { %v362_v31 = vadd.f32 %v361_v15, %v287_v21  ;;  %v377_v38 = vmax.f32 %v360_v29, 0.0 }
  0xde   : > { %v363_v18 = vpop.f32.mrf.mxu0 }
  0xdf   : > { %v364_v24 = vadd.f32 %v363_v18, %v287_v21  ;;  %v378_v40 = vmax.f32 %v362_v31, 0.0 }
  0xe0   : > { %v367_v19 = vpop.f32.mrf.mxu0 }
  0xe1   : > { %v368_v27 = vadd.f32 %v367_v19, %v292_v17  ;;  %v379_v33 = vmax.f32 %v364_v24, 0.0  ;;  %v385_v44 = vpack.c.bf16 %v378_v40, %v376_v43 }
  0xe2   : > { %v369_v20 = vpop.f32.mrf.mxu0 }
  0xe3   : > { %v370_v25 = vadd.f32 %v369_v20, %v292_v17  ;;  %v380_v37 = vmax.f32 %v368_v27, 0.0  ;;  %v386_v42 = vpack.c.bf16 %v379_v33, %v377_v38 }
  0xe4   : > { %v371_v23 = vpop.f32.mrf.mxu0 }
  0xe5   : > { %v372_v26 = vadd.f32 %v371_v23, %v297_v22  ;;  %v381_v34 = vmax.f32 %v370_v25, 0.0 }
  0xe6   : > { %v373_v28 = vpop.f32.mrf.mxu0 }
  0xe7   : > { %v374_v30 = vadd.f32 %v373_v28, %v297_v22  ;;  %v382_v32 = vmax.f32 %v372_v26, 0.0 }
  0xe9   : > { %v383_v35 = vmax.f32 %v374_v30, 0.0  ;;  %v387_v41 = vpack.c.bf16 %v382_v32, %v380_v37 }
  0xeb   : > { %v388_v39 = vpack.c.bf16 %v383_v35, %v381_v34 }
  0xed   : > { %411 = vmatprep.subr.bf16.mxu1 %v388_v39 }
  0xee   : > { %412 = vmatpush1.bf16.msra.mxu1 %v387_v41 }
  0xef   : > { %413 = vmatprep.subr.bf16.mxu1 %v386_v42 }
  0xf2   : > { %414 = vmatpush1.bf16.msra.mxu1 %v385_v44 }
  0xf5   : > { %550 = vmatmul.mubr.msk.bf16.vlgmr.msra.gmra.mxu1 %vm395_vm2, %v384_v45 }
 0x1b5   : > { %v433_v46 = vpop.f32.mrf.mxu1 }
 0x1b6   : > { %v434_v49 = vadd.f32 %v433_v46, %v393_v47 }
 0x1b7   : > { %v435_v48 = vpop.f32.mrf.mxu1 }
 0x1b8   : > { %v436_v50 = vadd.f32 %v435_v48, %v393_v47 }
 0x1b9   : > { %v437_v51 = vpop.f32.mrf.mxu1 }
 0x1ba   : > { %v556_v52 = vpack.c.bf16 %v436_v50, %v434_v49 }
 0x1bb   : > { %v438_v53 = vpop.f32.mrf.mxu1 }
 0x1bc   : > { %448 = vst [vmem:[%s262_s23] sm:$0xff] %v556_v52 }
 0x1bd PF: > { %s15_s20 = sadd.s32 1, %s609_s20   ;;  %s712_s18 = smov %s605_s19 }
 0x1be   : > { %p12_p5 = scmp.ge.s32.totalorder %s15_s20, 4   ;;  %s713_s19 = smov %s715_s21 }
 0x1c0   :  { %14 = sbr.rel (!%p12_p5) target bundleno = 2 (0x2), region = 70 }

</bundles_post_ra>
